<compile_context>
chip_gen: v6e
topology: v6e:2x2x1
jax: 0.10.0
libtpu: 0.0.40
codegen_flags: <defaults>
</compile_context>

<pallas_src>
import math
import functools
import numpy as np
import jax
import jax.numpy as jnp
from jax.experimental import pallas as pl
from jax.experimental.pallas import tpu as pltpu


# ----------------------------- Pallas kernel --------------------------------

def _fused_attention_kernel(x_ref, w_qkv_ref, w_proj_ref, b_proj_ref,
                            cos_ref, sin_ref, rot_ref, o_ref, o_acc_ref,
                            *, num_heads):
    # x_ref:      (1, N, C) f32
    # w_qkv_ref:  (C, 3C) bf16  (q-columns pre-scaled by 1/sqrt(head_dim))
    # w_proj_ref: (C, C)  bf16      b_proj_ref: (1, C) f32
    # cos_ref/sin_ref: (N, C) f32 rope tables tiled across heads
    #                  (ones / zeros on the pass-through half of each head)
    # rot_ref:    (C, C) bf16 block-diagonal signed rotate_half permutation
    # o_acc_ref:  (N, C) f32 VMEM scratch collecting per-head outputs
    N, C = x_ref.shape[1], x_ref.shape[2]
    d = C // num_heads

    x = x_ref[0]                                         # (N, C) f32
    w_qkv = w_qkv_ref[...]                               # bf16
    w_proj = w_proj_ref[...]                              # bf16
    cos = cos_ref[...]                                    # (N, C) f32
    sin = sin_ref[...]
    rot = rot_ref[...]                                    # (C, C) bf16

    # qkv projection: bf16 MXU inputs, f32 accumulation; stays in VMEM.
    qkv = jnp.dot(x.astype(jnp.bfloat16), w_qkv,
                  preferred_element_type=jnp.float32)     # (N, 3C) f32

    def rope(t):                                          # (N, C) -> (N, C)
        # Full-width rotary across all heads at once: pass-through channels
        # have cos=1 / sin=0 and zero rows+cols in `rot`, so no slicing of the
        # rotary half and a single K=C MXU pass for rotate_half.
        rotated = jnp.dot(t.astype(jnp.bfloat16), rot,
                          preferred_element_type=jnp.float32)
        return t * cos + rotated * sin

    q16 = rope(qkv[:, :C]).astype(jnp.bfloat16)           # scale folded in w_qkv
    k16 = rope(qkv[:, C:2 * C]).astype(jnp.bfloat16)
    v16 = qkv[:, 2 * C:].astype(jnp.bfloat16)

    # TODO(synk): for N >~ 1k tokens replace the full (N, N) score
    # materialization with a KV-tile online-softmax loop (f32 m/l/acc scratch)
    # and tile the query rows; switch this head loop to lax.fori_loop for
    # large head counts to bound vreg live ranges.
    for h in range(num_heads):                            # tiny, static unroll
        qh = q16[:, h * d:(h + 1) * d]                    # (N, d) bf16
        kh = k16[:, h * d:(h + 1) * d]
        vh = v16[:, h * d:(h + 1) * d]

        # scores (N, N): bf16 MXU matmul (q @ k^T), f32 accumulation.
        s = jax.lax.dot_general(qh, kh, (((1,), (1,)), ((), ())),
                                preferred_element_type=jnp.float32)

        m = jnp.max(s, axis=-1, keepdims=True)            # f32 softmax stats
        p = jnp.exp(s - m)
        l = jnp.sum(p, axis=-1, keepdims=True)

        o_h = jnp.dot(p.astype(jnp.bfloat16), vh,         # (N, d) f32
                      preferred_element_type=jnp.float32)
        # Normalize AFTER the PV matmul; reciprocal runs on the EUP slot.
        o_acc_ref[:, h * d:(h + 1) * d] = o_h * pl.reciprocal(l, approx=True)

    # Output projection fused across heads: single K=C matmul + f32 bias add.
    y = jnp.dot(o_acc_ref[...].astype(jnp.bfloat16), w_proj,
                preferred_element_type=jnp.float32) + b_proj_ref[...]
    # TODO(synk): when C < 128, present a lane-dense (N//2, 2C) output slab to
    # avoid masked partial stores (needs a safe in-kernel row-pair repack).
    o_ref[0] = y.astype(o_ref.dtype)


# ------------------------------ host helpers ---------------------------------

def make_axial_pixel_freqs(num_heads, dim, H, W):
    """RotaryEmbedding(dim=head_dim//4, freqs_for='pixel', max_freq=H*W)
    .get_axial_freqs(H, W), flattened to (H*W, head_dim//2)."""
    head_dim = dim // num_heads
    n_freqs = (head_dim // 4) // 2
    max_freq = H * W
    freq_vals = np.linspace(1.0, max_freq / 2.0, n_freqs, dtype=np.float32) * np.pi

    def axis_freqs(size):
        pos = np.linspace(-1.0, 1.0, size, dtype=np.float32)    # (size,)
        f = pos[:, None] * freq_vals[None, :]                    # (size, n_freqs)
        return np.repeat(f, 2, axis=-1)                          # (size, head_dim//4)

    fh = axis_freqs(H)
    fw = axis_freqs(W)
    quarter = head_dim // 4
    freqs = np.concatenate(
        [np.broadcast_to(fh[:, None, :], (H, W, quarter)),
         np.broadcast_to(fw[None, :, :], (H, W, quarter))], axis=-1)
    return freqs.reshape(H * W, head_dim // 2).astype(np.float32)


def prepare_kernel_params(master, num_heads, dim):
    """One-time host transforms: bf16 weights, folded attention scale,
    fused (across heads) rope tables, block-diagonal rotate_half matrix."""
    head_dim = dim // num_heads
    freqs = np.array(master["freqs"], dtype=np.float32)          # (N, rot_dim)
    N, rot_dim = freqs.shape

    cos_h = np.concatenate(
        [np.cos(freqs), np.ones((N, head_dim - rot_dim), np.float32)], axis=-1)
    sin_h = np.concatenate(
        [np.sin(freqs), np.zeros((N, head_dim - rot_dim), np.float32)], axis=-1)
    cos_c = np.tile(cos_h, (1, num_heads))                        # (N, C)
    sin_c = np.tile(sin_h, (1, num_heads))

    # Per-head signed rotate_half permutation, zero-padded on pass-through.
    P = np.zeros((head_dim, head_dim), np.float32)
    for i in range(rot_dim // 2):
        P[2 * i + 1, 2 * i] = -1.0    # out[2i]   = -x[2i+1]
        P[2 * i, 2 * i + 1] = 1.0     # out[2i+1] =  x[2i]
    rot_c = np.zeros((dim, dim), np.float32)                      # block-diag
    for h in range(num_heads):
        rot_c[h * head_dim:(h + 1) * head_dim,
              h * head_dim:(h + 1) * head_dim] = P

    # Fold 1/sqrt(head_dim) into the q-columns of w_qkv (rope is linear).
    w_qkv = np.array(master["w_qkv"], dtype=np.float32)
    w_qkv[:, :dim] *= 1.0 / math.sqrt(head_dim)

    return {
        "w_qkv": jnp.asarray(w_qkv, dtype=jnp.bfloat16),
        "w_proj": jnp.asarray(np.array(master["w_proj"]), dtype=jnp.bfloat16),
        "b_proj": jnp.asarray(master["b_proj"], dtype=jnp.float32),
        "cos": jnp.asarray(cos_c),
        "sin": jnp.asarray(sin_c),
        "rot": jnp.asarray(rot_c, dtype=jnp.bfloat16),
    }


def attention_forward(x, kp, num_heads):
    B, N, C = x.shape
    d = C // num_heads
    kernel = functools.partial(_fused_attention_kernel, num_heads=num_heads)

    flops = int(B * (2 * N * C * 3 * C                 # qkv projection
                     + 2 * (2 * N * C * C)             # rotate_half (q and k)
                     + num_heads * (4 * N * N * d)     # scores + PV
                     + 2 * N * C * C))                 # output projection
    transcendentals = int(B * num_heads * (N * N + N))
    bytes_accessed = int(B * (2 * N * C * 4)           # x in + out
                         + 2 * (3 * C * C + C * C + C * C)   # bf16 weights + rot
                         + 4 * (2 * N * C + C))              # rope tables + bias

    # Explicit scoped-VMEM limit: >= the 32 MiB default, 2x margin over the
    # live-footprint estimate, capped below physical VMEM (v7x = 64 MiB).
    blocks = (N * C * 4 + 3 * C * C * 2 + C * C * 2 + C * 4
              + 2 * N * C * 4 + C * C * 2 + N * C * 4)
    interm = 4 * N * 3 * C * 4 + 3 * N * N * 4 + N * C * 4
    vmem_limit = int(min(max(2 * (2 * blocks + interm), 32 * 1024 * 1024),
                         96 * 1024 * 1024))

    return pl.pallas_call(
        kernel,
        out_shape=jax.ShapeDtypeStruct((B, N, C), x.dtype),
        grid=(B,),
        in_specs=[
            pl.BlockSpec((1, N, C), lambda b: (b, 0, 0)),     # x
            pl.BlockSpec((C, 3 * C), lambda b: (0, 0)),       # w_qkv (bf16)
            pl.BlockSpec((C, C), lambda b: (0, 0)),           # w_proj (bf16)
            pl.BlockSpec((1, C), lambda b: (0, 0)),           # b_proj (f32)
            pl.BlockSpec((N, C), lambda b: (0, 0)),           # cos (fused heads)
            pl.BlockSpec((N, C), lambda b: (0, 0)),           # sin
            pl.BlockSpec((C, C), lambda b: (0, 0)),           # rot (bf16)
        ],
        out_specs=pl.BlockSpec((1, N, C), lambda b: (b, 0, 0)),
        scratch_shapes=[pltpu.VMEM((N, C), jnp.float32)],     # per-head outputs
        # TODO(synk): add a second "parallel" grid axis (query tiles or heads)
        # so both v7x TensorCores stay busy when B is 1 or odd.
        compiler_params=pltpu.CompilerParams(
            dimension_semantics=("parallel",),
            vmem_limit_bytes=vmem_limit),
        cost_estimate=pl.CostEstimate(
            flops=flops, transcendentals=transcendentals,
            bytes_accessed=bytes_accessed),
    )(x, kp["w_qkv"], kp["w_proj"], kp["b_proj"], kp["cos"], kp["sin"], kp["rot"])


def attention_reference(x, master, num_heads):
    """Pure-JAX f32 reference (mirrors the PyTorch module)."""
    B, N, C = x.shape
    d = C // num_heads
    freqs = master["freqs"]
    cos = jnp.cos(freqs)
    sin = jnp.sin(freqs)
    rot_dim = freqs.shape[-1]

    qkv = x.reshape(B * N, C) @ master["w_qkv"]
    qkv = qkv.reshape(B, N, 3, num_heads, d)
    q = qkv[:, :, 0].transpose(0, 2, 1, 3)
    k = qkv[:, :, 1].transpose(0, 2, 1, 3)
    v = qkv[:, :, 2].transpose(0, 2, 1, 3)

    def rope(t):
        tr, tp = t[..., :rot_dim], t[..., rot_dim:]
        x1, x2 = tr[..., 0::2], tr[..., 1::2]
        rotated = jnp.stack([-x2, x1], axis=-1).reshape(tr.shape)
        return jnp.concatenate([tr * cos + rotated * sin, tp], axis=-1)

    q, k = rope(q), rope(k)
    s = jnp.einsum("bhnd,bhmd->bhnm", q, k) / jnp.sqrt(jnp.float32(d))
    p = jax.nn.softmax(s, axis=-1)
    o = jnp.einsum("bhnm,bhmd->bhnd", p, v)
    o = o.transpose(0, 2, 1, 3).reshape(B * N, C)
    return (o @ master["w_proj"] + master["b_proj"]).reshape(B, N, C)


# ---------------------------------- main --------------------------------------

if __name__ == "__main__":
    # dim=64, 2 heads (head_dim=32), 4x4 frame -> N=16 tokens, batch=2.
    B, num_heads, H, W = 2, 2, 4, 4
    dim = 64
    N = H * W

    key = jax.random.PRNGKey(0)
    kx, kqkv, kproj, kb = jax.random.split(key, 4)

    x = jax.random.normal(kx, (B, N, dim), dtype=jnp.float32)
    freqs = make_axial_pixel_freqs(num_heads, dim, H, W)       # (N, head_dim//2)

    master = {
        # qkv_bias=False (module default) -> no qkv bias
        "w_qkv": 0.02 * jax.random.normal(kqkv, (dim, 3 * dim), dtype=jnp.float32),
        "w_proj": 0.02 * jax.random.normal(kproj, (dim, dim), dtype=jnp.float32),
        "b_proj": 0.02 * jax.random.normal(kb, (1, dim), dtype=jnp.float32),
        "freqs": jnp.asarray(freqs),
    }
    kparams = prepare_kernel_params(master, num_heads, dim)

    out = jax.block_until_ready(attention_forward(x, kparams, num_heads))
    ref = attention_reference(x, master, num_heads)

    assert out.shape == (B, N, dim)
    # bf16 matmul inputs + approx reciprocal vs. f32 reference -> bf16-level tol.
    np.testing.assert_allclose(np.asarray(out), np.asarray(ref),
                               rtol=2e-2, atol=2e-3)
    print("KERNEL_OK")
</pallas_src>

<mosaic_0001>
module attributes {stable_mosaic.version = 11 : i64} {
  func.func @_fused_attention_kernel(%arg0: i32, %arg1: memref<1x16x64xf32, #tpu.memory_space<vmem>>, %arg2: memref<64x192xbf16, #tpu.memory_space<vmem>>, %arg3: memref<64x64xbf16, #tpu.memory_space<vmem>>, %arg4: memref<1x64xf32, #tpu.memory_space<vmem>>, %arg5: memref<16x64xf32, #tpu.memory_space<vmem>>, %arg6: memref<16x64xf32, #tpu.memory_space<vmem>>, %arg7: memref<64x64xbf16, #tpu.memory_space<vmem>>, %arg8: memref<1x16x64xf32, #tpu.memory_space<vmem>>, %arg9: memref<16x64xf32, #tpu.memory_space<vmem>>) attributes {dimension_semantics = [#tpu.dimension_semantics<parallel>], iteration_bounds = array<i64: 2>, scalar_prefetch = 0 : i64, scratch_operands = 1 : i64, tpu.core_type = #tpu.core_type<tc>, window_params = [{transform_indices = @transform_0, window_bounds = array<i64: 1, 16, 64>}, {pipeline_mode = #tpu.pipeline_mode<synchronous>, transform_indices = @transform_1, window_bounds = array<i64: 64, 192>}, {pipeline_mode = #tpu.pipeline_mode<synchronous>, transform_indices = @transform_2, window_bounds = array<i64: 64, 64>}, {pipeline_mode = #tpu.pipeline_mode<synchronous>, transform_indices = @transform_3, window_bounds = array<i64: 1, 64>}, {pipeline_mode = #tpu.pipeline_mode<synchronous>, transform_indices = @transform_4, window_bounds = array<i64: 16, 64>}, {pipeline_mode = #tpu.pipeline_mode<synchronous>, transform_indices = @transform_5, window_bounds = array<i64: 16, 64>}, {pipeline_mode = #tpu.pipeline_mode<synchronous>, transform_indices = @transform_6, window_bounds = array<i64: 64, 64>}, {transform_indices = @transform_7, window_bounds = array<i64: 1, 16, 64>}]} {
    %c0 = arith.constant 0 : index
    %c0_0 = arith.constant 0 : index
    %c0_1 = arith.constant 0 : index
    %0 = vector.load %arg1[%c0, %c0_0, %c0_1] : memref<1x16x64xf32, #tpu.memory_space<vmem>>, vector<1x16x64xf32>
    %1 = vector.shape_cast %0 : vector<1x16x64xf32> to vector<16x64xf32>
    %c0_2 = arith.constant 0 : index
    %c0_3 = arith.constant 0 : index
    %2 = vector.load %arg2[%c0_2, %c0_3] : memref<64x192xbf16, #tpu.memory_space<vmem>>, vector<64x192xbf16>
    %c0_4 = arith.constant 0 : index
    %c0_5 = arith.constant 0 : index
    %3 = vector.load %arg3[%c0_4, %c0_5] : memref<64x64xbf16, #tpu.memory_space<vmem>>, vector<64x64xbf16>
    %c0_6 = arith.constant 0 : index
    %c0_7 = arith.constant 0 : index
    %4 = vector.load %arg5[%c0_6, %c0_7] : memref<16x64xf32, #tpu.memory_space<vmem>>, vector<16x64xf32>
    %c0_8 = arith.constant 0 : index
    %c0_9 = arith.constant 0 : index
    %5 = vector.load %arg6[%c0_8, %c0_9] : memref<16x64xf32, #tpu.memory_space<vmem>>, vector<16x64xf32>
    %c0_10 = arith.constant 0 : index
    %c0_11 = arith.constant 0 : index
    %6 = vector.load %arg7[%c0_10, %c0_11] : memref<64x64xbf16, #tpu.memory_space<vmem>>, vector<64x64xbf16>
    %7 = arith.truncf %1 : vector<16x64xf32> to vector<16x64xbf16>
    %cst = arith.constant dense<0.000000e+00> : vector<16x192xf32>
    %8 = tpu.matmul %7, %2, %cst {dimension_numbers = #tpu.dot_dimension_numbers<[1], [0], [0], [1], [0, 0, 1, 1], [], []>} : vector<16x64xbf16>, vector<64x192xbf16>, vector<16x192xf32> -> vector<16x192xf32>
    %9 = vector.extract_strided_slice %8 {offsets = [0, 0], sizes = [16, 64], strides = [1, 1]} : vector<16x192xf32> to vector<16x64xf32>
    %10 = arith.truncf %9 : vector<16x64xf32> to vector<16x64xbf16>
    %cst_12 = arith.constant dense<0.000000e+00> : vector<16x64xf32>
    %11 = tpu.matmul %10, %6, %cst_12 {dimension_numbers = #tpu.dot_dimension_numbers<[1], [0], [0], [1], [0, 0, 1, 1], [], []>} : vector<16x64xbf16>, vector<64x64xbf16>, vector<16x64xf32> -> vector<16x64xf32>
    %12 = arith.mulf %9, %4 : vector<16x64xf32>
    %13 = arith.mulf %11, %5 : vector<16x64xf32>
    %14 = arith.addf %12, %13 : vector<16x64xf32>
    %15 = arith.truncf %14 : vector<16x64xf32> to vector<16x64xbf16>
    %16 = vector.extract_strided_slice %8 {offsets = [0, 64], sizes = [16, 64], strides = [1, 1]} : vector<16x192xf32> to vector<16x64xf32>
    %17 = arith.truncf %16 : vector<16x64xf32> to vector<16x64xbf16>
    %cst_13 = arith.constant dense<0.000000e+00> : vector<16x64xf32>
    %18 = tpu.matmul %17, %6, %cst_13 {dimension_numbers = #tpu.dot_dimension_numbers<[1], [0], [0], [1], [0, 0, 1, 1], [], []>} : vector<16x64xbf16>, vector<64x64xbf16>, vector<16x64xf32> -> vector<16x64xf32>
    %19 = arith.mulf %16, %4 : vector<16x64xf32>
    %20 = arith.mulf %18, %5 : vector<16x64xf32>
    %21 = arith.addf %19, %20 : vector<16x64xf32>
    %22 = arith.truncf %21 : vector<16x64xf32> to vector<16x64xbf16>
    %23 = vector.extract_strided_slice %8 {offsets = [0, 128], sizes = [16, 64], strides = [1, 1]} : vector<16x192xf32> to vector<16x64xf32>
    %24 = arith.truncf %23 : vector<16x64xf32> to vector<16x64xbf16>
    %25 = vector.extract_strided_slice %15 {offsets = [0, 0], sizes = [16, 32], strides = [1, 1]} : vector<16x64xbf16> to vector<16x32xbf16>
    %26 = vector.extract_strided_slice %22 {offsets = [0, 0], sizes = [16, 32], strides = [1, 1]} : vector<16x64xbf16> to vector<16x32xbf16>
    %27 = vector.extract_strided_slice %24 {offsets = [0, 0], sizes = [16, 32], strides = [1, 1]} : vector<16x64xbf16> to vector<16x32xbf16>
    %cst_14 = arith.constant dense<0.000000e+00> : vector<16x16xf32>
    %28 = tpu.matmul %25, %26, %cst_14 {dimension_numbers = #tpu.dot_dimension_numbers<[1], [1], [0], [0], [0, 0, 1, 0], [], []>} : vector<16x32xbf16>, vector<16x32xbf16>, vector<16x16xf32> -> vector<16x16xf32>
    %cst_15 = arith.constant dense<0xFF800000> : vector<16xf32>
    %29 = vector.multi_reduction <maximumf>, %28, %cst_15 [1] : vector<16x16xf32> to vector<16xf32>
    %30 = vector.shape_cast %29 : vector<16xf32> to vector<16x1xf32>
    %31 = vector.broadcast %30 : vector<16x1xf32> to vector<16x16xf32>
    %32 = arith.subf %28, %31 : vector<16x16xf32>
    %33 = math.exp %32 : vector<16x16xf32>
    %cst_16 = arith.constant dense<0.000000e+00> : vector<16xf32>
    %34 = vector.multi_reduction <add>, %33, %cst_16 [1] : vector<16x16xf32> to vector<16xf32>
    %35 = vector.shape_cast %34 : vector<16xf32> to vector<16x1xf32>
    %36 = arith.truncf %33 : vector<16x16xf32> to vector<16x16xbf16>
    %cst_17 = arith.constant dense<0.000000e+00> : vector<16x32xf32>
    %37 = tpu.matmul %36, %27, %cst_17 {dimension_numbers = #tpu.dot_dimension_numbers<[1], [0], [0], [1], [0, 0, 1, 1], [], []>} : vector<16x16xbf16>, vector<16x32xbf16>, vector<16x32xf32> -> vector<16x32xf32>
    %38 = tpu.reciprocal %35 {approx = true} : vector<16x1xf32> -> vector<16x1xf32>
    %39 = vector.broadcast %38 : vector<16x1xf32> to vector<16x32xf32>
    %40 = arith.mulf %37, %39 : vector<16x32xf32>
    %c0_18 = arith.constant 0 : index
    %c0_19 = arith.constant 0 : index
    %41 = vector.load %arg9[%c0_18, %c0_19] : memref<16x64xf32, #tpu.memory_space<vmem>>, vector<16x32xf32>
    tpu.vector_store %arg9[%c0_18, %c0_19], %40 {strides = array<i32>} : memref<16x64xf32, #tpu.memory_space<vmem>>, vector<16x32xf32>,
    %42 = vector.extract_strided_slice %15 {offsets = [0, 32], sizes = [16, 32], strides = [1, 1]} : vector<16x64xbf16> to vector<16x32xbf16>
    %43 = vector.extract_strided_slice %22 {offsets = [0, 32], sizes = [16, 32], strides = [1, 1]} : vector<16x64xbf16> to vector<16x32xbf16>
    %44 = vector.extract_strided_slice %24 {offsets = [0, 32], sizes = [16, 32], strides = [1, 1]} : vector<16x64xbf16> to vector<16x32xbf16>
    %cst_20 = arith.constant dense<0.000000e+00> : vector<16x16xf32>
    %45 = tpu.matmul %42, %43, %cst_20 {dimension_numbers = #tpu.dot_dimension_numbers<[1], [1], [0], [0], [0, 0, 1, 0], [], []>} : vector<16x32xbf16>, vector<16x32xbf16>, vector<16x16xf32> -> vector<16x16xf32>
    %cst_21 = arith.constant dense<0xFF800000> : vector<16xf32>
    %46 = vector.multi_reduction <maximumf>, %45, %cst_21 [1] : vector<16x16xf32> to vector<16xf32>
    %47 = vector.shape_cast %46 : vector<16xf32> to vector<16x1xf32>
    %48 = vector.broadcast %47 : vector<16x1xf32> to vector<16x16xf32>
    %49 = arith.subf %45, %48 : vector<16x16xf32>
    %50 = math.exp %49 : vector<16x16xf32>
    %cst_22 = arith.constant dense<0.000000e+00> : vector<16xf32>
    %51 = vector.multi_reduction <add>, %50, %cst_22 [1] : vector<16x16xf32> to vector<16xf32>
    %52 = vector.shape_cast %51 : vector<16xf32> to vector<16x1xf32>
    %53 = arith.truncf %50 : vector<16x16xf32> to vector<16x16xbf16>
    %cst_23 = arith.constant dense<0.000000e+00> : vector<16x32xf32>
    %54 = tpu.matmul %53, %44, %cst_23 {dimension_numbers = #tpu.dot_dimension_numbers<[1], [0], [0], [1], [0, 0, 1, 1], [], []>} : vector<16x16xbf16>, vector<16x32xbf16>, vector<16x32xf32> -> vector<16x32xf32>
    %55 = tpu.reciprocal %52 {approx = true} : vector<16x1xf32> -> vector<16x1xf32>
    %56 = vector.broadcast %55 : vector<16x1xf32> to vector<16x32xf32>
    %57 = arith.mulf %54, %56 : vector<16x32xf32>
    %c0_24 = arith.constant 0 : index
    %c32 = arith.constant 32 : index
    %58 = vector.load %arg9[%c0_24, %c32] : memref<16x64xf32, #tpu.memory_space<vmem>>, vector<16x32xf32>
    tpu.vector_store %arg9[%c0_24, %c32], %57 {strides = array<i32>} : memref<16x64xf32, #tpu.memory_space<vmem>>, vector<16x32xf32>,
    %c0_25 = arith.constant 0 : index
    %c0_26 = arith.constant 0 : index
    %59 = vector.load %arg9[%c0_25, %c0_26] : memref<16x64xf32, #tpu.memory_space<vmem>>, vector<16x64xf32>
    %60 = arith.truncf %59 : vector<16x64xf32> to vector<16x64xbf16>
    %cst_27 = arith.constant dense<0.000000e+00> : vector<16x64xf32>
    %61 = tpu.matmul %60, %3, %cst_27 {dimension_numbers = #tpu.dot_dimension_numbers<[1], [0], [0], [1], [0, 0, 1, 1], [], []>} : vector<16x64xbf16>, vector<64x64xbf16>, vector<16x64xf32> -> vector<16x64xf32>
    %c0_28 = arith.constant 0 : index
    %c0_29 = arith.constant 0 : index
    %62 = vector.load %arg4[%c0_28, %c0_29] : memref<1x64xf32, #tpu.memory_space<vmem>>, vector<1x64xf32>
    %63 = vector.broadcast %62 : vector<1x64xf32> to vector<16x64xf32>
    %64 = arith.addf %61, %63 : vector<16x64xf32>
    %c0_30 = arith.constant 0 : index
    %c0_31 = arith.constant 0 : index
    %c0_32 = arith.constant 0 : index
    %65 = vector.load %arg8[%c0_30, %c0_31, %c0_32] : memref<1x16x64xf32, #tpu.memory_space<vmem>>, vector<1x16x64xf32>
    %66 = vector.shape_cast %65 : vector<1x16x64xf32> to vector<16x64xf32>
    %67 = vector.shape_cast %64 : vector<16x64xf32> to vector<1x16x64xf32>
    tpu.vector_store %arg8[%c0_30, %c0_31, %c0_32], %67 {strides = array<i32>} : memref<1x16x64xf32, #tpu.memory_space<vmem>>, vector<1x16x64xf32>,
    return
  }
  func.func @transform_0(%arg0: i32) -> (i32, i32, i32) {
    %c0_i32 = arith.constant 0 : i32
    %c0_i32_0 = arith.constant 0 : i32
    %c0_i32_1 = arith.constant 0 : i32
    return %arg0, %c0_i32, %c0_i32_0 : i32, i32, i32
  }
  func.func @transform_1(%arg0: i32) -> (i32, i32) {
    %c0_i32 = arith.constant 0 : i32
    %c0_i32_0 = arith.constant 0 : i32
    %c0_i32_1 = arith.constant 0 : i32
    return %c0_i32, %c0_i32_0 : i32, i32
  }
  func.func @transform_2(%arg0: i32) -> (i32, i32) {
    %c0_i32 = arith.constant 0 : i32
    %c0_i32_0 = arith.constant 0 : i32
    %c0_i32_1 = arith.constant 0 : i32
    return %c0_i32, %c0_i32_0 : i32, i32
  }
  func.func @transform_3(%arg0: i32) -> (i32, i32) {
    %c0_i32 = arith.constant 0 : i32
    %c0_i32_0 = arith.constant 0 : i32
    %c0_i32_1 = arith.constant 0 : i32
    return %c0_i32, %c0_i32_0 : i32, i32
  }
  func.func @transform_4(%arg0: i32) -> (i32, i32) {
    %c0_i32 = arith.constant 0 : i32
    %c0_i32_0 = arith.constant 0 : i32
    %c0_i32_1 = arith.constant 0 : i32
    return %c0_i32, %c0_i32_0 : i32, i32
  }
  func.func @transform_5(%arg0: i32) -> (i32, i32) {
    %c0_i32 = arith.constant 0 : i32
    %c0_i32_0 = arith.constant 0 : i32
    %c0_i32_1 = arith.constant 0 : i32
    return %c0_i32, %c0_i32_0 : i32, i32
  }
  func.func @transform_6(%arg0: i32) -> (i32, i32) {
    %c0_i32 = arith.constant 0 : i32
    %c0_i32_0 = arith.constant 0 : i32
    %c0_i32_1 = arith.constant 0 : i32
    return %c0_i32, %c0_i32_0 : i32, i32
  }
  func.func @transform_7(%arg0: i32) -> (i32, i32, i32) {
    %c0_i32 = arith.constant 0 : i32
    %c0_i32_0 = arith.constant 0 : i32
    %c0_i32_1 = arith.constant 0 : i32
    return %arg0, %c0_i32, %c0_i32_0 : i32, i32, i32
  }
}

</mosaic_0001>

<bundles_post_ra>
// kernel: tpu_custom_call.1
= control target key start
LH: loop header
LB: loop body
LE: loop exit
PB: predicated region body
PF: predicated region fallthrough
CT: control target
= control target key end

     0   :  { %s2003_s0 = inlined_call_operand.hbm [shape: f32[2,16,64], index: 0, kind: input, shape index: {}]   ;;  %s2004_s1 = inlined_call_operand.hbm [shape: bf16[64,192], index: 1, kind: input, shape index: {}]   ;;  %s2005_s2 = inlined_call_operand.hbm [shape: bf16[64,64], index: 2, kind: input, shape index: {}]   ;;  %s2006_s3 = inlined_call_operand.vmem [shape: f32[1,64], index: 3, kind: input, shape index: {}]   ;;  %s2007_s4 = inlined_call_operand.hbm [shape: f32[16,64], index: 4, kind: input, shape index: {}]   ;;  %s2008_s5 = inlined_call_operand.hbm [shape: f32[16,64], index: 5, kind: input, shape index: {}]   ;;  %s2009_s6 = inlined_call_operand.hbm [shape: bf16[64,64], index: 6, kind: input, shape index: {}]   ;;  %s2010_s7 = inlined_call_operand.hbm [shape: f32[2,16,64], index: 7, kind: output, shape index: {}]  }
   0x1   :  { %2017 = sst [smem:[#allocation20_spill]] %s2004_s1 }
   0x2   :  { %12 = vsyncpa [#allocation4], 0 }
   0x3   :  { %14 = vsyncpa [#allocation4 + $0x1], 0 }
   0x4   :  { %15 = vsyncpa [#allocation7], 0 }
   0x5   :  { %16 = vsyncpa [#allocation10], 0 }
   0x6   :  { %17 = vsyncpa [#allocation13], 0 }
   0x7   :  { %18 = vsyncpa [#allocation5], 0 }
   0x8   :  { %20 = vsyncpa [#allocation5 + $0x1], 0  ;;  %s1680_s24 = smov 0   ;;  %s1682_s25 = smov 0  }
   0x9   :  { %s1684_s26 = smov 0   ;;  %s1686_s27 = smov 0  }
   0xa LB: > { %s1621_s28 = smov [#allocation6]   ;;  %s1701_s30 = sadd.s32 4294967295, %s1619_s27   ;;  %s1619_s27 = sphi %s1686_s27, %s2042_s27   ;;  %s1615_s26 = sphi %s1684_s26, %s2041_s26   ;;  %s1611_s25 = sphi %s1682_s25, %s2040_s25   ;;  %s1607_s24 = sphi %s1680_s24, %s2039_s24  }
   0xb   : > { %s221_s29 = sshll.u32 %s1621_s28, 4  ;;  %p1107_p0 = scmp.ge.s32.totalorder %s1619_s27, 1  ;;  %s222_s29 = int_to_ptr.vmem [resolvable:$true] %s221_s29 }
   0xc   : > { %p2012_p1 = scmp.eq.s32.totalorder %s1701_s30, 0  ;;  %p209_p2 = scmp.lt.s32.totalorder %s1619_s27, 3 }
   0xd   : > { %s1622_s9 = smov [#allocation9]   ;;  %s1623_s12 = smov [#allocation8]  }
   0xe   : > { %p1706_p3 = pnand %p1107_p0, %p209_p2  ;;  %s250_s10 = sshll.u32 %s1622_s9, 4  ;;  %s1719_s10 = int_to_ptr.vmem [resolvable:$true] %s250_s10 }
   0xf   : > { %s234_s13 = sshll.u32 %s1623_s12, 4  ;;  %s1396_s15 = scalar_lea.vmem %s222_s29, 1024  ;;  %s1721_s13 = int_to_ptr.vmem [resolvable:$true] %s234_s13 }
  0x10   : > { %s2018_s8 = scalar_select %p1706_p3, 1, 0 }
  0x11   : > { %p1264_p5 = pneg %p1706_p3  ;;  %p1397_p8 = scmp.ne.s32.totalorder %s222_s29, %s1396_s15 }
  0x12   : > { %p1404_p11 = scmp.lt.s32.totalorder %s222_s29, %s222_s29  ;;  %p1405_p12 = scmp.lt.s32.totalorder %s1396_s15, %s1396_s15 }
  0x13   : > { %p1715_p6 = pnand %p1264_p5, %p2012_p1 }
  0x14   : > { %p1406_p13 = por %p1405_p12, %p1404_p11 }
  0x15   : > { %p1725_p7 = pneg %p1715_p6 }
  0x17   : > { %p1399_p9 = pnand %p1397_p8, %p1725_p7 }
  0x19   : > { %p1400_p10 = pneg %p1399_p9 }
  0x1b   : > { %p1407_p0 = pnand %p1406_p13, %p1400_p10 }
  0x1d   : > { %1410 = shalt.err (!%p1407_p0)
}
  0x1e   : > { %s2011_s16 = smov 128   ;;  %s2013_s17 = smov 8  }
  0x1f   : > { %s2021_s1 = sld [smem:[#allocation20_spill]]  ;;  %s1422_s20 = scalar_lea.vmem %s1719_s10, 256 }
  0x20   : > { %p1423_p2 = scmp.ne.s32.totalorder %s1719_s10, %s1422_s20  ;;  %p1430_p9 = scmp.lt.s32.totalorder %s1719_s10, %s1719_s10 }
  0x21   : > { %p1431_p10 = scmp.lt.s32.totalorder %s1422_s20, %s1422_s20 }
  0x22   : > { %p1425_p5 = pnand %p1423_p2, %p1725_p7 }
  0x23   : > { %p1432_p11 = por %p1431_p10, %p1430_p9 }
  0x24   : > { %p1426_p8 = pneg %p1425_p5 }
  0x25   : > { %1267 = dma.hbm_to_vmem [thread:$0]  (!%p1715_p6), %s2021_s1, 1024, %s222_s29, [#allocation7], %s2011_s16, %s2011_s16, %s2013_s17  }
  0x26   : > { %p1433_p12 = pnand %p1432_p11, %p1426_p8 }
  0x28   : > { %1436 = shalt.err (!%p1433_p12)
}
  0x29   : > { %1273 = dma.hbm_to_vmem [thread:$0]  (!%p1715_p6), %s2007_s4, 256, %s1719_s10, [#allocation10], %s2011_s16, %s2011_s16, %s2013_s17  }
  0x2a   : > { %s1448_s23 = scalar_lea.vmem %s1721_s13, 512  ;;  %p1456_p5 = scmp.lt.s32.totalorder %s1721_s13, %s1721_s13 }
  0x2b   : > { %p1449_p13 = scmp.ne.s32.totalorder %s1721_s13, %s1448_s23  ;;  %p1457_p8 = scmp.lt.s32.totalorder %s1448_s23, %s1448_s23 }
  0x2d   : > { %p1451_p0 = pnand %p1449_p13, %p1725_p7  ;;  %p1458_p9 = por %p1457_p8, %p1456_p5 }
  0x2f   : > { %p1452_p2 = pneg %p1451_p0 }
  0x31   : > { %p1459_p10 = pnand %p1458_p9, %p1452_p2 }
  0x33   : > { %1462 = shalt.err (!%p1459_p10)
}
  0x34   : > { %s1626_s28 = smov 64   ;;  %s1627_s29 = smov 4  }
  0x35   : > { %1270 = dma.hbm_to_vmem [thread:$0]  (!%p1715_p6), %s2005_s2, 512, %s1721_s13, [#allocation7], %s1626_s28, %s1626_s28, %s1627_s29  }
  0x36   : > { %s1628_s12 = smov [#allocation11]   ;;  %s1629_s18 = smov [#allocation12]  }
  0x37   : > { %s263_s15 = sshll.u32 %s1628_s12, 4  ;;  %s276_s19 = sshll.u32 %s1629_s18, 4  ;;  %s264_s15 = int_to_ptr.vmem [resolvable:$true] %s263_s15  ;;  %s277_s19 = int_to_ptr.vmem [resolvable:$true] %s276_s19 }
  0x38   : > { %s1474_s20 = scalar_lea.vmem %s264_s15, 256  ;;  %p1482_p0 = scmp.lt.s32.totalorder %s264_s15, %s264_s15 }
  0x39   : > { %p1475_p11 = scmp.ne.s32.totalorder %s264_s15, %s1474_s20  ;;  %p1483_p2 = scmp.lt.s32.totalorder %s1474_s20, %s1474_s20 }
  0x3b   : > { %p1477_p12 = pnand %p1475_p11, %p1725_p7  ;;  %p1484_p5 = por %p1483_p2, %p1482_p0 }
  0x3d   : > { %p1478_p13 = pneg %p1477_p12 }
  0x3f   : > { %p1485_p8 = pnand %p1484_p5, %p1478_p13 }
  0x41   : > { %1488 = shalt.err (!%p1485_p8)
}
  0x42   : > { %1276 = dma.hbm_to_vmem [thread:$0]  (!%p1715_p6), %s2008_s5, 256, %s264_s15, [#allocation10], %s2011_s16, %s2011_s16, %s2013_s17  }
  0x43   : > { %s1500_s22 = scalar_lea.vmem %s277_s19, 512  ;;  %p1508_p12 = scmp.lt.s32.totalorder %s277_s19, %s277_s19 }
  0x44   : > { %p1501_p9 = scmp.ne.s32.totalorder %s277_s19, %s1500_s22  ;;  %p1509_p0 = scmp.lt.s32.totalorder %s1500_s22, %s1500_s22 }
  0x46   : > { %p1503_p10 = pnand %p1501_p9, %p1725_p7  ;;  %p1510_p13 = por %p1509_p0, %p1508_p12 }
  0x48   : > { %p1504_p11 = pneg %p1503_p10 }
  0x4a   : > { %p1511_p2 = pnand %p1510_p13, %p1504_p11 }
  0x4c   : > { %1514 = shalt.err (!%p1511_p2)
}
  0x4d   : > { %1279 = dma.hbm_to_vmem [thread:$0]  (!%p1715_p6), %s2009_s6, 512, %s277_s19, [#allocation13], %s1626_s28, %s1626_s28, %s1627_s29  }
  0x4e   : > { %s1106_s11 = sadd.s32 4294967294, %s1619_s27   ;;  %s1791_s14 = sadd.s32 1, %s1619_s27  }
  0x4f   : > { %s33_s10 = sadd.s32 1, %s1615_s26  ;;  %s30_s12 = ssub.s32 %s1619_s27, %s1791_s14 }
  0x50   : > { %p40_p7 = scmp.ne.s32.totalorder %s1615_s26, %s1611_s25  ;;  %p31_p5 = scmp.eq.s32.totalorder %s30_s12, 0 }
  0x51   : > { %p41_p8 = scmp.eq.s32.totalorder %s1619_s27, 0  ;;  %p46_p9 = scmp.ne.s32.totalorder %s1611_s25, %s1607_s24 }
  0x52   : > { %p196_p10 = scmp.eq.s32.totalorder %s1701_s30, 1  ;;  %p202_p0 = scmp.eq.s32.totalorder %s1106_s11, 1 }
  0x53   : > { %s1803_s15 = scalar_select %p31_p5, %s1615_s26, %s33_s10  }
  0x54   : > { %p42_p11 = por %p41_p8, %p40_p7  ;;  %p1807_p12 = por %p2012_p1, %p46_p9 }
  0x55   : > { %p1811_p6 = por %p196_p10, %p40_p7  ;;  %p1293_p13 = scmp.lt.s32.totalorder %s1619_s27, 2 }
  0x56   : > { %s2022_s18 = scalar_select %p1807_p12, 1, 0 }
  0x57   : > { %s2023_s28 = scalar_select %p1811_p6, 1, 0 }
  0x58   : > { %s290_s29 = sand.u32 1, %s1615_s26   ;;  %p1817_p2 = por %p202_p0, %p46_p9 }
  0x59   : > { %s1114_s20 = sshll.u32 %s290_s29, 4  ;;  %s1155_s13 = sshll.u32 %s1619_s27, 8 }
  0x5a   : > { %s2024_s19 = scalar_select %p1817_p2, 1, 0 }
  0x5b   : > { %s1825_s23 = scalar_lea.hbm %s2003_s0, %s1155_s13  ;;  %s294_s9 = scalar_lea.vmem [#allocation3], %s1114_s20 }
  0x5c   : > { %s301_s10 = sshll.u32 %s294_s9, 4  ;;  %p1827_p7 = pnand %p1293_p13, %p42_p11  ;;  %s1831_s10 = int_to_ptr.vmem [resolvable:$true] %s301_s10 }
  0x5d   : > { %s1833_s12 = scalar_lea.sflag [#allocation4], %s290_s29  ;;  %s1515_s16 = scalar_lea.hbm %s1825_s23, 256 }
  0x5e   : > { %p1516_p5 = scmp.ne.s32.totalorder %s1825_s23, %s1515_s16  ;;  %p1517_p8 = pneg %p1827_p7 }
  0x5f   : > { %s1520_s20 = scalar_lea.hbm %s2003_s0, 512  ;;  %p1521_p11 = scmp.lt.s32.totalorder %s1825_s23, %s2003_s0 }
  0x60   : > { %p1518_p9 = pnand %p1517_p8, %p1516_p5  ;;  %p1522_p0 = scmp.lt.s32.totalorder %s1520_s20, %s1515_s16 }
  0x62   : > { %p1519_p10 = pneg %p1518_p9  ;;  %p1523_p13 = por %p1522_p0, %p1521_p11 }
  0x64   : > { %p1524_p4 = pnand %p1523_p13, %p1519_p10 }
  0x66   : > { %1527 = shalt.err (!%p1524_p4)
}
  0x67   : > { %s1528_s29 = scalar_lea.vmem %s1831_s10, 256  ;;  %s1630_s17 = smov [#allocation3]  }
  0x68   : > { %p1529_p1 = scmp.ne.s32.totalorder %s1831_s10, %s1528_s29  ;;  %s1533_s1 = sshll.u32 %s1630_s17, 4  ;;  %s1534_s1 = int_to_ptr.vmem [resolvable:$false] %s1533_s1 }
  0x69   : > { %s1535_s13 = scalar_lea.vmem %s1534_s1, 512  ;;  %p1536_p9 = scmp.lt.s32.totalorder %s1831_s10, %s1534_s1 }
  0x6a   : > { %p1531_p2 = pnand %p1529_p1, %p1517_p8  ;;  %p1537_p6 = scmp.lt.s32.totalorder %s1535_s13, %s1528_s29 }
  0x6c   : > { %p1532_p5 = pneg %p1531_p2  ;;  %p1538_p12 = por %p1537_p6, %p1536_p9 }
  0x6e   : > { %p1539_p3 = pnand %p1538_p12, %p1532_p5 }
  0x70   : > { %1542 = shalt.err (!%p1539_p3)
}
  0x71   : > { %s2026_s16 = smov 8   ;;  %s2027_s21 = smov 128  }
  0x72   : > { %1283 = dma.hbm_to_vmem [thread:$0]  (!%p1827_p7), %s1825_s23, 256, %s1831_s10, %s1833_s12, %s2027_s21, %s2027_s21, %s2026_s16  }
  0x73   : > { %p2028_p1 = scmp.ne.s32.totalorder %s2018_s8, 0 }
  0x74   : > { %s1860_s17 = sand.u32 (!%p2028_p1), 1, %s1611_s25   ;;  %p2029_p3 = scmp.ne.s32.totalorder (!%p2028_p1), %s2022_s18, 0 }
  0x75   : > { %313 = sbr.rel (%p2028_p1) target bundleno = 2163 (0x873), region = 48  ;;  %s1118_s1 = sshll.u32 (!%p2028_p1), %s1860_s17, 4 }
  0x76   : > { %s316_s20 = scalar_lea.sflag (!%p2028_p1), [#allocation4], %s1860_s17  ;;  %s1866_s11 = scalar_lea.vmem (!%p2028_p1), [#allocation3], %s1118_s1 }
  0x7a   : > { %1586 = dma.done.wait (%p2029_p3), %s316_s20, 256  }
  0x7b   : > { %1588 = vsyncadd (%p2029_p3), %s316_s20, 4294967040  ;;  %p2030_p4 = scmp.eq.s32.totalorder %s1701_s30, 0 }
  0x7d   : > { %1590 = dma.done.wait (%p2030_p4), [#allocation7], 1536   ;;  %p2031_p12 = pmov %p2030_p4 }
  0x7e   : > { %p2032_p6 = pmov %p2030_p4 }
  0x7f   : > { %1592 = vsyncadd (%p2031_p12), [#allocation7], 4294965760 }
  0x80   : > { %1594 = dma.done.wait (%p2032_p6), [#allocation10], 512   ;;  %p2033_p2 = pmov %p2030_p4 }
  0x82   : > { %1596 = vsyncadd (%p2033_p2), [#allocation10], 4294966784  ;;  %p2034_p7 = pmov %p2033_p2 }
  0x83   : > { %p2035_p8 = pmov %p2033_p2 }
  0x84   : > { %1598 = dma.done.wait (%p2034_p7), [#allocation13], 512  }
  0x85   : > { %1600 = vsyncadd (%p2035_p8), [#allocation13], 4294966784  ;;  %v1631_v0 = vmov 0   ;;  %v1632_v1 = vmov 0.0   ;;  %v1349_v2 = vld [vmem:[#allocation6 + $0x34] ss:$8 sps:$4 sm:$0xff]  }
  0x86   : > { %478 = vmatprep.mubr.bf16.mxu0 %v1631_v0  ;;  %1180 = vmatprep.subr.bf16.mxu1 %v1632_v1  ;;  %v1351_v3 = vld [vmem:[#allocation6 + $0x30] ss:$8 sps:$4 sm:$0xff]   ;;  %v1352_v4 = vld [vmem:[#allocation6 + $0x24] ss:$8 sps:$4 sm:$0xff]   ;;  %v1354_v5 = vld [vmem:[#allocation6 + $0x20] ss:$8 sps:$4 sm:$0xff]  }
  0x87   : > { %454 = vmatprep.subr.bf16.mxu0 %v1349_v2  ;;  %v1355_v6 = vld [vmem:[#allocation6 + $0x14] ss:$8 sps:$4 sm:$0xff]   ;;  %v1357_v7 = vld [vmem:[#allocation6 + $0x10] ss:$8 sps:$4 sm:$0xff]   ;;  %v1358_v8 = vld [vmem:[#allocation6 + $0x4] ss:$8 sps:$4 sm:$0xff]  }
  0x88   : > { %455 = vmatpush1.bf16.msra.mxu0 %v1351_v3  ;;  %v390_v9 = vld [vmem:[#allocation9 + $0x8] sm:$0xff]  ;;  %s1633_s8 = smov 64   ;;  %v1361_v10 = vld [vmem:[#allocation12 + $0x18] sm:$0xff]   ;;  %v1362_v11 = vld [vmem:[#allocation12 + $0x10] sm:$0xff]   ;;  %vm442_vm0 = vcmask 523264   ;;  %vm1634_vm1 = vmmov 0  }
  0x89   : > { %456 = vmatprep.subr.bf16.mxu0 %v1352_v4  ;;  %616 = vrot.lane.b32.xlu1 %v390_v9, %s1633_s8  ;;  %v1360_v12 = vld [vmem:[#allocation6] ss:$8 sps:$4 sm:$0xff]   ;;  %v391_v24 = vld [vmem:[#allocation11] sm:$0xff]  ;;  %v392_v29 = vld [vmem:[#allocation11 + $0x8] sm:$0xff]  ;;  %vm639_vm2 = vcmask 261120   ;;  %vm687_vm3 = vcmask 130048  }
  0x8a   : > { %v371_v13 = vld [vmem:[%s1866_s11] sm:$0xff]  ;;  %v372_v14 = vld [vmem:[%s1866_s11 + $0x8] sm:$0xff]  ;;  %1181 = vmatpush3.bf16.msra.mxu1 %v1361_v10  ;;  %1188 = vmatprep.mubr.msk.bf16.mxu1 %vm1634_vm1, %v1632_v1  ;;  %s1635_s18 = smov 96   ;;  %s1636_s23 = smov 32   ;;  %vm888_vm4 = vcmask 523520  }
  0x8b   : > { %1182 = vmatprep.subr.bf16.mxu1 %v1632_v1  ;;  %v401_v15 = vpack.c.bf16 %v372_v14, %v371_v13  ;;  %v1363_v16 = vld [vmem:[#allocation12 + $0x8] sm:$0xff]   ;;  %v1364_v17 = vld [vmem:[#allocation12] sm:$0xff]   ;;  %s369_s22 = scalar_lea.vmem [#allocation14], %s1118_s1  ;;  %s1156_s29 = sshll.u32 %s1701_s30, 8 }
  0x8c   : > { %457 = vmatpush1.bf16.msra.mxu0 %v1354_v5  ;;  %v389_v22 = vld [vmem:[#allocation9] sm:$0xff]  ;;  %s985_s9 = sshll.u32 %s369_s22, 4  ;;  %s1959_s21 = scalar_lea.hbm %s2010_s7, %s1156_s29  ;;  %s1954_s9 = int_to_ptr.vmem [resolvable:$true] %s985_s9 }
  0x8d   : > { %458 = vmatprep.subr.bf16.mxu0 %v1355_v6  ;;  %s972_s1 = scalar_lea.sflag [#allocation5], %s1860_s17  ;;  %s1543_s30 = scalar_lea.vmem %s1954_s9, 256 }
  0x8e   : > { %1183 = vmatpush3.bf16.msra.mxu1 %v1362_v11  ;;  %p1544_p10 = scmp.ne.s32.totalorder %s1954_s9, %s1543_s30  ;;  %p2036_p11 = scmp.ne.s32.totalorder %s2023_s28, 0 }
  0x8f   : > { %1184 = vmatprep.subr.bf16.mxu1 %v1632_v1  ;;  %s1637_s20 = smov [#allocation14]  }
  0x90   : > { %459 = vmatpush1.bf16.msra.mxu0 %v1357_v7  ;;  %p1545_p0 = pnand %p1544_p10, %p2036_p11  ;;  %s1547_s11 = sshll.u32 %s1637_s20, 4  ;;  %s1548_s11 = int_to_ptr.vmem [resolvable:$false] %s1547_s11 }
  0x91   : > { %460 = vmatprep.subr.bf16.mxu0 %v1358_v8  ;;  %p1550_p5 = scmp.lt.s32.totalorder %s1954_s9, %s1548_s11 }
  0x92   : > { %1185 = vmatpush3.bf16.msra.mxu1 %v1363_v16  ;;  %p1546_p13 = pneg %p1545_p0 }
  0x93   : > { %1186 = vmatprep.subr.bf16.mxu1 %v1632_v1 }
  0x94   : > { %461 = vmatpush1.bf16.msra.mxu0 %v1360_v12 }
  0x95   : > { %1192 = vmatprep.subr.bf16.mxu0 %v1632_v1 }
  0x96   : > { %1187 = vmatpush3.bf16.msra.mxu1 %v1364_v17 }
  0x97   : > { %1133 = vmatmul.mubr.msk.bf16.vlgmr.msra.gmra.mxu0 %vm442_vm0, %v401_v15  ;;  %1204 = vmatprep.subr.bf16.mxu1 %v1632_v1 }
  0x98   : > { %1193 = vmatpush3.bf16.msra.mxu0 %v1361_v10  ;;  %1200 = vmatprep.mubr.msk.bf16.mxu0 %vm1634_vm1, %v1632_v1 }
  0x99   : > { %1194 = vmatprep.subr.bf16.mxu0 %v1632_v1 }
  0x9c   : > { %1195 = vmatpush3.bf16.msra.mxu0 %v1362_v11 }
  0x9d   : > { %1196 = vmatprep.subr.bf16.mxu0 %v1632_v1 }
  0xa0   : > { %1197 = vmatpush3.bf16.msra.mxu0 %v1363_v16 }
  0xa1   : > { %1198 = vmatprep.subr.bf16.mxu0 %v1632_v1 }
  0xa4   : > { %1199 = vmatpush3.bf16.msra.mxu0 %v1364_v17 }
  0xa5   : > { %1228 = vmatprep.subr.bf16.mxu0 %v1632_v1 }
  0xfb   : > { %v617_v44 = vpop.permute.xlu1 %616 }
 0x157   : > { %v480_v18 = vpop.f32.mrf.mxu0 }
 0x158   : > { %v558_v26 = vmul.f32 %v480_v18, %v389_v22 }
 0x159   : > { %v482_v19 = vpop.f32.mrf.mxu0 }
 0x15b   : > { %v484_v20 = vpop.f32.mrf.mxu0 }
 0x15c   : > { %v489_v21 = vpack.c.bf16 %v484_v20, %v480_v18  ;;  %v559_v32 = vmul.f32 %v484_v20, %v390_v9  ;;  %v621_v48 = vmul.f32 %v617_v44, %v484_v20  ;;  %v1366_v44 = vld [vmem:[#allocation8 + $0x10] sm:$0xff]  }
 0x15d   : > { %v486_v37 = vpop.f32.mrf.mxu0 }
 0x15e   : > { %566 = vrot.lane.b32.xlu0 %v489_v21, %s1633_s8  ;;  %1189 = vmatmul.mubr.msk.bf16.vlgmr.msra.gmra.mxu1 %vm442_vm0, %v489_v21  ;;  %v635_v55 = vpack.c.bf16 %v486_v37, %v482_v19 }
 0x15f   : > { %1206 = vmatprep.mubr.msk.bf16.mxu1 %vm1634_vm1, %v1632_v1 }
 0x162   : > { %614 = vrot.lane.b32.xlu0 %v389_v22, %s1633_s8 }
 0x1d0   : > { %v567_v23 = vpop.permute.xlu0 %566 }
 0x1d1   : > { %1201 = vmatmul.mubr.msk.bf16.vlgmr.msra.gmra.mxu0 %vm442_vm0, %v567_v23 }
 0x1d2   : > { %1236 = vmatprep.mubr.msk.bf16.mxu0 %vm1634_vm1, %v1632_v1 }
 0x1d4   : > { %v615_v45 = vpop.permute.xlu0 %614 }
 0x1d5   : > { %v620_v47 = vmul.f32 %v615_v45, %v480_v18  ;;  %v1367_v45 = vld [vmem:[#allocation8 + $0x8] sm:$0xff]  }
 0x21e   : > { %v551_v25 = vpop.f32.mrf.mxu1 }
 0x21f   : > { %v560_v27 = vmul.f32 %v551_v25, %v391_v24 }
 0x220   : > { %v1190_v28 = vpop.f32.mrf.mxu1 }
 0x221   : > { %v562_v30 = vadd.f32 %v560_v27, %v558_v26 }
 0x222   : > { %v554_v31 = vpop.f32.mrf.mxu1 }
 0x223   : > { %v561_v33 = vmul.f32 %v554_v31, %v392_v29 }
 0x224   : > { %v1191_v34 = vpop.f32.mrf.mxu1 }
 0x225   : > { %v563_v35 = vadd.f32 %v561_v33, %v559_v32 }
 0x227   : > { %v564_v36 = vpack.c.bf16 %v563_v35, %v562_v30  ;;  %v1365_v35 = vld [vmem:[#allocation8 + $0x18] sm:$0xff]  }
 0x228   : > { %1229 = vmatpush3.bf16.msra.mxu0 %v1365_v35 }
 0x229   : > { %1230 = vmatprep.subr.bf16.mxu0 %v1632_v1 }
 0x22c   : > { %1231 = vmatpush3.bf16.msra.mxu0 %v1366_v44 }
 0x22d   : > { %1232 = vmatprep.subr.bf16.mxu0 %v1632_v1 }
 0x230   : > { %1233 = vmatpush3.bf16.msra.mxu0 %v1367_v45 }
 0x231   : > { %1234 = vmatprep.subr.bf16.mxu0 %v1632_v1 }
 0x291   : > { %v605_v38 = vpop.f32.mrf.mxu0 }
 0x292   : > { %v622_v39 = vmul.f32 %v605_v38, %v391_v24 }
 0x293   : > { %v1202_v40 = vpop.f32.mrf.mxu0 }
 0x294   : > { %626 = vrot.lane.b32.xlu1 %v622_v39, %s1633_s8 }
 0x295   : > { %v608_v41 = vpop.f32.mrf.mxu0 }
 0x296   : > { %v623_v42 = vmul.f32 %v608_v41, %v392_v29 }
 0x297   : > { %v1203_v43 = vpop.f32.mrf.mxu0 }
 0x298   : > { %628 = vrot.lane.b32.xlu0 %v623_v42, %s1633_s8 }
 0x306   : > { %v627_v46 = vpop.permute.xlu1 %626 }
 0x307   : > { %v632_v50 = vadd.f32 %v627_v46, %v620_v47  ;;  %v1368_v46 = vld [vmem:[#allocation8] sm:$0xff]  }
 0x308   : > { %1235 = vmatpush3.bf16.msra.mxu0 %v1368_v46 }
 0x30a   : > { %v629_v49 = vpop.permute.xlu0 %628 }
 0x30b   : > { %v633_v51 = vadd.f32 %v629_v49, %v621_v48 }
 0x30d   : > { %v634_v52 = vpack.c.bf16 %v633_v51, %v632_v50 }
 0x30f   : > { %637 = vrot.lane.b32.xlu1 %v634_v52, %s1633_s8  ;;  %s1549_s8 = scalar_lea.vmem %s1548_s11, 512 }
 0x310   : > { %p1551_p9 = scmp.lt.s32.totalorder %s1549_s8, %s1543_s30 }
 0x312   : > { %p1552_p1 = por %p1551_p9, %p1550_p5 }
 0x314   : > { %p1553_p3 = pnand %p1552_p1, %p1546_p13 }
 0x381   : > { %v638_v53 = vpop.permute.xlu1 %637 }
 0x382   : > { %v644_v54 = vsel %vm639_vm2, %v638_v53, 0 }
 0x383   : > { %1205 = vmatpush3.bf16.xpose.msra.mxu1 %v644_v54 }
 0x384   : > { %1210 = vmatprep.subr.bf16.mxu1 %v1632_v1 }
 0x38a   : > { %1207 = vmatmul.mubr.msk.bf16.vlgmr.msra.gmra.mxu1 %vm639_vm2, %v564_v36 }
 0x38b   : > { %1211 = vmatpush3.bf16.msra.mxu1 %v635_v55  ;;  %1212 = vmatprep.mubr.msk.bf16.mxu1 %vm1634_vm1, %v1632_v1 }
 0x38c   : > { %1216 = vmatprep.subr.bf16.mxu1 %v1632_v1 }
 0x44a   : > { %v680_v56 = vpop.f32.mrf.mxu1 }
 0x44b   : > { %v688_v57 = vsel %vm687_vm3, %v680_v56, -inf }
 0x44c   : > { %689 = vmax.xlane.f32.xlu0 %v688_v57  ;;  %v1208_v58 = vpop.f32.mrf.mxu1 }
 0x44e   : > { %v683_v59 = vpop.f32.mrf.mxu1 }
 0x44f   : > { %v691_v60 = vsel %vm687_vm3, %v683_v59, -inf }
 0x450   : > { %692 = vmax.xlane.f32.xlu1 %v691_v60  ;;  %v1209_v61 = vpop.f32.mrf.mxu1 }
 0x461   : > { %758 = vrot.lane.b32.xlu1 %v564_v36, %s1635_s18 }
 0x462   : > { %760 = vrot.lane.b32.xlu0 %v634_v52, %s1636_s23 }
 0x4d5   : > { %v690_v62 = vpop.xlane.xlu0 %689 }
 0x4d6   : > { %v694_v63 = vsub.f32 %v680_v56, %v690_v62 }
 0x4d8   : > { %v696_v0 = vmul.f32 1.442695, %v694_v63 }
 0x4d9   : > { %v693_v2 = vpop.xlane.xlu1 %692  ;;  %v761_v7 = vpop.permute.xlu0 %760 }
 0x4da   : > { %v695_v3 = vsub.f32 %v683_v59, %v693_v2  ;;  %1369 = vpow2.f32 %v696_v0  ;;  %v766_v9 = vsel %vm639_vm2, %v761_v7, 0  ;;  %v1144_v59 = vld [vmem:[%s2006_s3] ss:$0 sm:$0xff] }
 0x4dc   : > { %v698_v4 = vmul.f32 1.442695, %v695_v3 }
 0x4dd   : > { %v759_v10 = vpop.permute.xlu1 %758 }
 0x4de   : > { %1371 = vpow2.f32 %v698_v4 }
 0x4e7   : > { %v1370_v5 = vpop.eup %1369 }
 0x4e8   : > { %v700_v33 = vsel %vm687_vm3, %v1370_v5, 0.0 }
 0x4eb   : > { %v1372_v6 = vpop.eup %1371 }
 0x4ec   : > { %v706_v8 = vpack.c.bf16 %v1372_v6, %v1370_v5  ;;  %v703_v34 = vsel %vm687_vm3, %v1372_v6, 0.0 }
 0x4ee   : > { %1213 = vmatmul.mubr.msk.bf16.vlgmr.msra.gmra.mxu1 %vm687_vm3, %v706_v8 }
 0x4ef   : > { %1217 = vmatpush3.bf16.xpose.msra.mxu1 %v766_v9  ;;  %1218 = vmatprep.mubr.msk.bf16.mxu1 %vm1634_vm1, %v1632_v1 }
 0x4f0   : > { %1222 = vmatprep.subr.bf16.mxu1 %v1632_v1 }
 0x4f6   : > { %1219 = vmatmul.mubr.msk.bf16.vlgmr.msra.gmra.mxu1 %vm639_vm2, %v759_v10 }
 0x4f7   : > { %1224 = vmatprep.mubr.msk.bf16.mxu1 %vm1634_vm1, %v1632_v1 }
 0x5ae   : > { %v744_v11 = vpop.f32.mrf.mxu1 }
 0x5b0   : > { %v1214_v12 = vpop.f32.mrf.mxu1 }
 0x5b2   : > { %v747_v13 = vpop.f32.mrf.mxu1 }
 0x5b4   : > { %v1215_v14 = vpop.f32.mrf.mxu1 }
 0x5b6   : > { %v802_v15 = vpop.f32.mrf.mxu1 }
 0x5b7   : > { %v809_v16 = vsel %vm687_vm3, %v802_v15, -inf }
 0x5b8   : > { %810 = vmax.xlane.f32.xlu0 %v809_v16  ;;  %v1220_v17 = vpop.f32.mrf.mxu1 }
 0x5ba   : > { %v805_v18 = vpop.f32.mrf.mxu1 }
 0x5bb   : > { %v812_v19 = vsel %vm687_vm3, %v805_v18, -inf }
 0x5bc   : > { %813 = vmax.xlane.f32.xlu1 %v812_v19  ;;  %v1221_v20 = vpop.f32.mrf.mxu1 }
 0x5ce   : > { %829 = vrot.lane.b32.xlu0 %v635_v55, %s1635_s18 }
 0x641   : > { %v811_v21 = vpop.xlane.xlu0 %810 }
 0x642   : > { %v815_v22 = vsub.f32 %v802_v15, %v811_v21 }
 0x644   : > { %v817_v23 = vmul.f32 1.442695, %v815_v22 }
 0x645   : > { %v830_v24 = vpop.permute.xlu0 %829  ;;  %v814_v25 = vpop.xlane.xlu1 %813 }
 0x646   : > { %1373 = vpow2.f32 %v817_v23  ;;  %v816_v26 = vsub.f32 %v805_v18, %v814_v25  ;;  %1223 = vmatpush3.bf16.msra.mxu1 %v830_v24 }
 0x648   : > { %v819_v27 = vmul.f32 1.442695, %v816_v26 }
 0x64a   : > { %1375 = vpow2.f32 %v819_v27 }
 0x653   : > { %v1374_v28 = vpop.eup %1373 }
 0x654   : > { %v821_v29 = vsel %vm687_vm3, %v1374_v28, 0.0 }
 0x655   : > { %822 = vadd.xlane.f32.xlu1 %v821_v29 }
 0x657   : > { %v1376_v30 = vpop.eup %1375 }
 0x658   : > { %v824_v31 = vsel %vm687_vm3, %v1376_v30, 0.0  ;;  %v827_v32 = vpack.c.bf16 %v1376_v30, %v1374_v28 }
 0x659   : > { %825 = vadd.xlane.f32.xlu1 %v824_v31 }
 0x65a   : > { %1225 = vmatmul.mubr.msk.bf16.vlgmr.msra.gmra.mxu1 %vm687_vm3, %v827_v32 }
 0x65d   : > { %701 = vadd.xlane.f32.xlu1 %v700_v33 }
 0x661   : > { %704 = vadd.xlane.f32.xlu1 %v703_v34 }
 0x6de   : > { %v823_v36 = vpop.xlane.xlu1 %822 }
 0x6e2   : > { %v826_v37 = vpop.xlane.xlu1 %825 }
 0x6e6   : > { %v702_v38 = vpop.xlane.xlu1 %701 }
 0x6e7   : > { %1377 = vrcp.f32 %v702_v38 }
 0x6ea   : > { %v705_v39 = vpop.xlane.xlu1 %704 }
 0x6eb   : > { %1379 = vrcp.f32 %v705_v39 }
 0x6ec   : > { %1381 = vrcp.f32 %v823_v36 }
 0x6ed   : > { %1383 = vrcp.f32 %v826_v37 }
 0x6f4   : > { %v1378_v40 = vpop.eup %1377 }
 0x6f5   : > { %v753_v41 = vmul.f32 %v1378_v40, %v744_v11 }
 0x6f7   : > { %755 = vst.msk [vmem:[#allocation2] sm:$0xff] %vm639_vm2, %v753_v41 }
 0x6f8   : > { %v1380_v42 = vpop.eup %1379 }
 0x6f9   : > { %v754_v43 = vmul.f32 %v1380_v42, %v747_v13  ;;  %v1382_v47 = vpop.eup %1381 }
 0x6fa   : > { %v1384_v51 = vpop.eup %1383 }
 0x6fb   : > { %756 = vst.msk [vmem:[#allocation2 + $0x8] sm:$0xff] %vm639_vm2, %v754_v43 }
 0x71a   : > { %v869_v48 = vpop.f32.mrf.mxu1 }
 0x71b   : > { %v878_v49 = vmul.f32 %v1382_v47, %v869_v48 }
 0x71c   : > { %v1226_v50 = vpop.f32.mrf.mxu1 }
 0x71d   : > { %882 = vrot.lane.b32.xlu1 %v878_v49, %s1636_s23 }
 0x71e   : > { %v872_v52 = vpop.f32.mrf.mxu1 }
 0x71f   : > { %v879_v53 = vmul.f32 %v1384_v51, %v872_v52 }
 0x720   : > { %v1227_v54 = vpop.f32.mrf.mxu1 }
 0x721   : > { %884 = vrot.lane.b32.xlu0 %v879_v53, %s1636_s23 }
 0x78f   : > { %v883_v55 = vpop.permute.xlu1 %882 }
 0x790   : > { %889 = vst.msk [vmem:[#allocation2] sm:$0xff] %vm888_vm4, %v883_v55 }
 0x793   : > { %v885_v56 = vpop.permute.xlu0 %884 }
 0x794   : > { %890 = vst.msk [vmem:[#allocation2 + $0x8] sm:$0xff] %vm888_vm4, %v885_v56 }
 0x797   : > { %v891_v1 = vld [vmem:[#allocation2] sm:$0xff] }
 0x79b   : > { %v892_v57 = vld [vmem:[#allocation2 + $0x8] sm:$0xff] }
 0x79c   : > { %v893_v58 = vpack.c.bf16 %v892_v57, %v891_v1 }
 0x79e   : > { %1237 = vmatmul.mubr.msk.bf16.vlgmr.msra.gmra.mxu0 %vm442_vm0, %v893_v58 }
 0x85e   : > { %v962_v60 = vpop.f32.mrf.mxu0 }
 0x85f   : > { %v963_v61 = vadd.f32 %v1144_v59, %v962_v60 }
 0x860   : > { %v1238_v62 = vpop.f32.mrf.mxu0 }
 0x861   : > { %969 = vst.msk [vmem:[%s369_s22] sm:$0xff] %vm442_vm0, %v963_v61 }
 0x862   : > { %v965_v63 = vpop.f32.mrf.mxu0 }
 0x863   : > { %v966_v0 = vadd.f32 %v1144_v59, %v965_v63 }
 0x864   : > { %v1239_v2 = vpop.f32.mrf.mxu0 }
 0x865   : > { %970 = vst.msk [vmem:[%s369_s22 + $0x8] sm:$0xff] %vm442_vm0, %v966_v0 }
 0x866   : > { %1556 = shalt.err (!%p1553_p3)
}
 0x867   : > { %s1557_s18 = scalar_lea.hbm %s1959_s21, 256  ;;  %s1561_s12 = scalar_lea.hbm %s2010_s7, 512 }
 0x868   : > { %p1558_p4 = scmp.ne.s32.totalorder %s1959_s21, %s1557_s18  ;;  %p1562_p2 = scmp.lt.s32.totalorder %s1959_s21, %s2010_s7 }
 0x869   : > { %p1563_p7 = scmp.lt.s32.totalorder %s1561_s12, %s1557_s18 }
 0x86a   : > { %p1559_p12 = pnand %p1558_p4, %p2036_p11 }
 0x86b   : > { %p1564_p8 = por %p1563_p7, %p1562_p2 }
 0x86c   : > { %p1560_p6 = pneg %p1559_p12 }
 0x86e   : > { %p1565_p10 = pnand %p1564_p8, %p1560_p6 }
 0x870   : > { %1568 = shalt.err (!%p1565_p10)
}
 0x871   : > { %s1638_s13 = smov 128   ;;  %s1639_s16 = smov 8  }
 0x872   : > { %1262 = dma.vmem_to_hbm [thread:$0]  (%p2036_p11), %s1954_s9, 256, %s1959_s21, %s972_s1, %s1638_s13, %s1638_s13, %s1639_s16  }
 0x873 PF: > { %s1000_s30 = sand.u32 1, %s1607_s24   ;;  %p2037_p0 = scmp.ne.s32.totalorder %s2024_s19, 0 }
 0x874   : > { %p2038_p13 = scmp.ge.s32.totalorder %s1619_s27, 2  ;;  %s1001_s20 = scalar_lea.sflag [#allocation5], %s1000_s30 }
 0x876   : > { %p1285_p5 = pnand %p2038_p13, %p2037_p0 }
 0x878   : > { %p1286_p9 = pneg %p1285_p5 }
 0x87a   : > { %1602 = dma.done.wait (%p1286_p9), %s1001_s20, 256  }
 0x87b   : > { %1604 = vsyncadd (%p1286_p9), %s1001_s20, 4294967040  ;;  %p23_p1 = scmp.ge.s32.totalorder %s1791_s14, 4   ;;  %s2039_s24 = smov %s1611_s25 }
 0x87c   : > { %s2040_s25 = smov %s1615_s26  ;;  %s2041_s26 = smov %s1803_s15 }
 0x87d   : > { %s2042_s27 = smov %s1791_s14  ;;  %25 = sbr.rel (!%p23_p1) target bundleno = 10 (0xa), region = 113 }
 0x882   :  { %1006 = vsyncpa [#allocation4], 1 }
 0x883   :  { %1008 = vsyncpa [#allocation4 + $0x1], 1 }
 0x884   :  { %1009 = vsyncpa [#allocation7], 1 }
 0x885   :  { %1010 = vsyncpa [#allocation10], 1 }
 0x886   :  { %1011 = vsyncpa [#allocation13], 1 }
 0x887   :  { %1012 = vsyncpa [#allocation5], 1 }
 0x888   :  { %1014 = vsyncpa [#allocation5 + $0x1], 1 }

</bundles_post_ra>
